<compile_context>
chip_gen: v5e
topology: v5e:2x2
jax: 0.10.0
libtpu: 0.0.40
codegen_flags: <defaults>
</compile_context>

<pallas_src>
import jax
import jax.numpy as jnp
from jax.experimental import pallas as pl
from jax.experimental.pallas import tpu as pltpu


def _round_up(v, m):
    return (v + m - 1) // m * m


def _layer_configs(C_in, num_channels, L, kernel_size, dilation_base):
    """Static per-layer (dilation, padding, C_in, C_out, L_in, L_out)."""
    cfgs = []
    c_in, l_in = C_in, L
    for i, c_out in enumerate(num_channels):
        d = dilation_base ** i
        p = (kernel_size - 1) * d // 2               # PyTorch integer division
        l_out = l_in + 2 * p - d * (kernel_size - 1)  # stride = 1
        cfgs.append((d, p, c_in, c_out, l_in, l_out))
        c_in, l_in = c_out, l_out
    return cfgs


def _make_tcn_kernel(kernel_size, cfgs, scratch_dtype, precision):
    n_layers = len(cfgs)

    def kernel(x_ref, w_ref, b_ref, out_ref, buf_a, buf_b):
        bufs = (buf_a, buf_b)

        # Stage the (already VMEM-resident) input block into the padded
        # scratch; zero only the p-wide margins so the scratch never needs a
        # full clear (it persists across grid steps).
        _, p0, c_in0, _, l_in0, _ = cfgs[0]
        if p0 > 0:
            z0 = jnp.zeros((c_in0, p0), scratch_dtype)
            buf_a[0:c_in0, 0:p0] = z0
            buf_a[0:c_in0, p0 + l_in0:2 * p0 + l_in0] = z0
        buf_a[0:c_in0, p0:p0 + l_in0] = x_ref[0].astype(scratch_dtype)

        for li, (d, p, c_in, c_out, l_in, l_out) in enumerate(cfgs):
            src = bufs[li % 2]
            dst = bufs[(li + 1) % 2]
            kc = kernel_size * c_in

            # Stack the k d-shifted views along the channel (sublane) axis so
            # the taps fold into a single MXU contraction with K = k*C_in.
            x_stk = jnp.concatenate(
                [src[0:c_in, j * d:j * d + l_out] for j in range(kernel_size)],
                axis=0)                                          # (k*C_in, L_out)
            w = w_ref[li, 0:c_out, 0:kc]                         # (C_out, k*C_in)
            y = jnp.dot(w, x_stk,
                        preferred_element_type=jnp.float32,
                        precision=precision)                     # (C_out, L_out)
            # Bias + ReLU fused once on the whole tile (VPU).
            y = jnp.maximum(y + b_ref[li, 0:c_out, :], 0.0)

            if li == n_layers - 1:
                out_ref[0] = y.astype(out_ref.dtype)
            else:
                # Write into the centered region the next layer will read;
                # zero only the thin left/right margins it will pad with.
                p_nxt = cfgs[li + 1][1]
                if p_nxt > 0:
                    z = jnp.zeros((c_out, p_nxt), scratch_dtype)
                    dst[0:c_out, 0:p_nxt] = z
                    dst[0:c_out, p_nxt + l_out:2 * p_nxt + l_out] = z
                dst[0:c_out, p_nxt:p_nxt + l_out] = y.astype(scratch_dtype)

    return kernel


def base_tcn_forward(x, params, *, kernel_size=2, dilation_base=2,
                     precision=None):
    """x: (B, C_in, L) channels-first.  params: list of (w, b) per layer with
    w: (C_out, C_in, k) *effective* conv weight (weight_norm already applied),
    b: (C_out,).  `precision` is passed to the in-kernel matmuls (None = TPU
    default bf16 pass with f32 accumulation; jax.lax.Precision.HIGHEST for
    strict f32 parity)."""
    B, C_in, L = x.shape
    num_channels = [w.shape[0] for (w, _) in params]
    cfgs = _layer_configs(C_in, num_channels, L, kernel_size, dilation_base)
    n_layers = len(cfgs)
    C_last, L_final = cfgs[-1][3], cfgs[-1][5]

    # ---- pack all layer params into single (8,128)-aligned VMEM slabs -------
    c_out_pad = _round_up(max(c[3] for c in cfgs), 8)
    k_pad = _round_up(max(kernel_size * c[2] for c in cfgs), 128)
    w_packed = jnp.zeros((n_layers, c_out_pad, k_pad), jnp.float32)
    b_packed = jnp.zeros((n_layers, c_out_pad, 1), jnp.float32)
    for li, (w, b) in enumerate(params):
        c_out, c_in, k = w.shape
        # Fold taps onto the contraction axis: column j*C_in + ci <-> w[:, ci, j]
        w2 = jnp.transpose(w, (0, 2, 1)).reshape(c_out, k * c_in)
        w_packed = w_packed.at[li, :c_out, :k * c_in].set(w2.astype(jnp.float32))
        b_packed = b_packed.at[li, :c_out, 0].set(b.astype(jnp.float32))

    # ---- ping-pong activation scratch (lane dim padded to 128) --------------
    # TODO(synk): flip scratch/compute dtype to bf16 on v6e/v7x for VMEM headroom.
    scratch_dtype = jnp.float32
    c_scr = _round_up(max([C_in] + [c[3] for c in cfgs]), 8)
    l_scr = _round_up(max(c[4] + 2 * c[1] for c in cfgs), 128)

    # ---- explicit VMEM budget ------------------------------------------------
    itemsize = 4
    footprint = (
        2 * c_scr * l_scr * itemsize                          # ping-pong scratch
        + 6 * c_scr * l_scr * itemsize                        # in-flight temporaries
        + 2 * (C_in * L + C_last * L_final) * itemsize        # x/out blocks (2-buf)
        + 2 * n_layers * c_out_pad * (k_pad + 128) * itemsize)  # packed params
    vmem_limit = int(min(64 * 2**20, max(32 * 2**20, 2 * footprint)))

    kernel = _make_tcn_kernel(kernel_size, cfgs, scratch_dtype, precision)

    # TODO(synk): for L too large for one batch row of activations to fit the
    # VMEM budget, add a time-tile grid axis with halo = sum_i d_i*(k-1).
    return pl.pallas_call(
        kernel,
        out_shape=jax.ShapeDtypeStruct((B, C_last, L_final), x.dtype),
        grid=(B,),
        in_specs=[
            pl.BlockSpec((1, C_in, L), lambda b: (b, 0, 0)),
            pl.BlockSpec((n_layers, c_out_pad, k_pad), lambda b: (0, 0, 0)),
            pl.BlockSpec((n_layers, c_out_pad, 1), lambda b: (0, 0, 0)),
        ],
        out_specs=pl.BlockSpec((1, C_last, L_final), lambda b: (b, 0, 0)),
        scratch_shapes=[pltpu.VMEM((c_scr, l_scr), scratch_dtype),
                        pltpu.VMEM((c_scr, l_scr), scratch_dtype)],
        compiler_params=pltpu.CompilerParams(
            dimension_semantics=("parallel",),
            vmem_limit_bytes=vmem_limit),
    )(x, w_packed, b_packed)


def weight_norm_weight(v, g):
    """PyTorch weight_norm (dim=0): w = g * v / ||v||, norm over all dims but 0."""
    norm = jnp.sqrt(jnp.sum(v * v, axis=(1, 2), keepdims=True))
    return g[:, None, None] * v / norm


def base_tcn_reference(x, params, *, kernel_size=2, dilation_base=2):
    """Pure-JAX reference mirroring the PyTorch forward (Conv1d + ReLU stack)."""
    h = x
    for i, (w, b) in enumerate(params):
        d = dilation_base ** i
        p = (kernel_size - 1) * d // 2
        y = jax.lax.conv_general_dilated(
            h, w, window_strides=(1,), padding=[(p, p)], rhs_dilation=(d,),
            dimension_numbers=("NCH", "OIH", "NCH"))
        h = jax.nn.relu(y + b[None, :, None])
    return h


if __name__ == "__main__":
    key = jax.random.PRNGKey(0)
    B, input_channels, L = 2, 4, 16
    num_channels = [8, 16]
    kernel_size, dilation_base = 2, 2

    keys = jax.random.split(key, 1 + 3 * len(num_channels))
    x = jax.random.normal(keys[0], (B, input_channels, L), dtype=jnp.float32)

    # Deterministic weight_norm parameters (v, g) + bias per layer; fold into
    # effective conv weights for both kernel and reference.
    params = []
    c_in = input_channels
    for i, c_out in enumerate(num_channels):
        kv, kg, kb = keys[1 + 3 * i], keys[2 + 3 * i], keys[3 + 3 * i]
        v = 0.1 * jax.random.normal(kv, (c_out, c_in, kernel_size), dtype=jnp.float32)
        g = 0.5 + 0.05 * jax.random.normal(kg, (c_out,), dtype=jnp.float32)
        b = 0.1 * jax.random.normal(kb, (c_out,), dtype=jnp.float32)
        params.append((weight_norm_weight(v, g), b))
        c_in = c_out

    out = base_tcn_forward(x, params, kernel_size=kernel_size,
                           dilation_base=dilation_base)
    out = jax.block_until_ready(out)

    ref = base_tcn_reference(x, params, kernel_size=kernel_size,
                             dilation_base=dilation_base)

    assert out.shape == ref.shape, (out.shape, ref.shape)
    # Tolerance covers TPU default matmul precision (bf16 MXU pass with f32
    # accumulation) in both the kernel and XLA's reference convolution.
    assert jnp.allclose(out, ref, rtol=1e-2, atol=1e-2), (
        "mismatch vs reference, max abs diff = %e"
        % float(jnp.max(jnp.abs(out - ref))))
    print("KERNEL_OK")
</pallas_src>

<mosaic_0001>
module attributes {stable_mosaic.version = 11 : i64} {
  func.func @kernel(%arg0: i32, %arg1: memref<1x4x16xf32, #tpu.memory_space<vmem>>, %arg2: memref<2x16x128xf32, #tpu.memory_space<vmem>>, %arg3: memref<2x16x1xf32, #tpu.memory_space<vmem>>, %arg4: memref<1x16x15xf32, #tpu.memory_space<vmem>>, %arg5: memref<16x128xf32, #tpu.memory_space<vmem>>, %arg6: memref<16x128xf32, #tpu.memory_space<vmem>>) attributes {dimension_semantics = [#tpu.dimension_semantics<parallel>], iteration_bounds = array<i64: 2>, scalar_prefetch = 0 : i64, scratch_operands = 2 : i64, tpu.core_type = #tpu.core_type<tc>, window_params = [{transform_indices = @transform_0, window_bounds = array<i64: 1, 4, 16>}, {pipeline_mode = #tpu.pipeline_mode<synchronous>, transform_indices = @transform_1, window_bounds = array<i64: 2, 16, 128>}, {pipeline_mode = #tpu.pipeline_mode<synchronous>, transform_indices = @transform_2, window_bounds = array<i64: 2, 16, 1>}, {transform_indices = @transform_3, window_bounds = array<i64: 1, 16, 15>}]} {
    %c0 = arith.constant 0 : index
    %c0_0 = arith.constant 0 : index
    %c0_1 = arith.constant 0 : index
    %0 = vector.load %arg1[%c0, %c0_0, %c0_1] : memref<1x4x16xf32, #tpu.memory_space<vmem>>, vector<1x4x16xf32>
    %1 = vector.shape_cast %0 : vector<1x4x16xf32> to vector<4x16xf32>
    %c0_2 = arith.constant 0 : index
    %c0_3 = arith.constant 0 : index
    %2 = vector.load %arg5[%c0_2, %c0_3] : memref<16x128xf32, #tpu.memory_space<vmem>>, vector<4x16xf32>
    tpu.vector_store %arg5[%c0_2, %c0_3], %1 {strides = array<i32>} : memref<16x128xf32, #tpu.memory_space<vmem>>, vector<4x16xf32>,
    %c0_4 = arith.constant 0 : index
    %c0_5 = arith.constant 0 : index
    %3 = vector.load %arg5[%c0_4, %c0_5] : memref<16x128xf32, #tpu.memory_space<vmem>>, vector<4x15xf32>
    %c0_6 = arith.constant 0 : index
    %c1 = arith.constant 1 : index
    %4 = vector.load %arg5[%c0_6, %c1] : memref<16x128xf32, #tpu.memory_space<vmem>>, vector<4x15xf32>
    %5 = tpu.concatenate %3, %4 in 0 : vector<4x15xf32>, vector<4x15xf32> -> vector<8x15xf32>
    %c0_7 = arith.constant 0 : index
    %c0_8 = arith.constant 0 : index
    %c0_9 = arith.constant 0 : index
    %6 = vector.load %arg2[%c0_7, %c0_8, %c0_9] : memref<2x16x128xf32, #tpu.memory_space<vmem>>, vector<1x8x8xf32>
    %7 = vector.shape_cast %6 : vector<1x8x8xf32> to vector<8x8xf32>
    %cst = arith.constant dense<0.000000e+00> : vector<8x15xf32>
    %8 = tpu.matmul %7, %5, %cst {dimension_numbers = #tpu.dot_dimension_numbers<[1], [0], [0], [1], [0, 0, 1, 1], [], []>} : vector<8x8xf32>, vector<8x15xf32>, vector<8x15xf32> -> vector<8x15xf32>
    %c0_10 = arith.constant 0 : index
    %c0_11 = arith.constant 0 : index
    %c0_12 = arith.constant 0 : index
    %9 = vector.load %arg3[%c0_10, %c0_11, %c0_12] : memref<2x16x1xf32, #tpu.memory_space<vmem>>, vector<1x8x1xf32>
    %10 = vector.shape_cast %9 : vector<1x8x1xf32> to vector<8x1xf32>
    %11 = vector.broadcast %10 : vector<8x1xf32> to vector<8x15xf32>
    %12 = arith.addf %8, %11 : vector<8x15xf32>
    %cst_13 = arith.constant 0.000000e+00 : f32
    %13 = vector.broadcast %cst_13 : f32 to vector<8x15xf32>
    %14 = arith.maximumf %12, %13 : vector<8x15xf32>
    %cst_14 = arith.constant 0.000000e+00 : f32
    %15 = vector.broadcast %cst_14 : f32 to vector<8x1xf32>
    %c0_15 = arith.constant 0 : index
    %c0_16 = arith.constant 0 : index
    %16 = vector.load %arg6[%c0_15, %c0_16] : memref<16x128xf32, #tpu.memory_space<vmem>>, vector<8x1xf32>
    tpu.vector_store %arg6[%c0_15, %c0_16], %15 {strides = array<i32>} : memref<16x128xf32, #tpu.memory_space<vmem>>, vector<8x1xf32>,
    %c0_17 = arith.constant 0 : index
    %c16 = arith.constant 16 : index
    %17 = vector.load %arg6[%c0_17, %c16] : memref<16x128xf32, #tpu.memory_space<vmem>>, vector<8x1xf32>
    tpu.vector_store %arg6[%c0_17, %c16], %15 {strides = array<i32>} : memref<16x128xf32, #tpu.memory_space<vmem>>, vector<8x1xf32>,
    %c0_18 = arith.constant 0 : index
    %c1_19 = arith.constant 1 : index
    %18 = vector.load %arg6[%c0_18, %c1_19] : memref<16x128xf32, #tpu.memory_space<vmem>>, vector<8x15xf32>
    tpu.vector_store %arg6[%c0_18, %c1_19], %14 {strides = array<i32>} : memref<16x128xf32, #tpu.memory_space<vmem>>, vector<8x15xf32>,
    %c0_20 = arith.constant 0 : index
    %c0_21 = arith.constant 0 : index
    %19 = vector.load %arg6[%c0_20, %c0_21] : memref<16x128xf32, #tpu.memory_space<vmem>>, vector<8x15xf32>
    %c0_22 = arith.constant 0 : index
    %c2 = arith.constant 2 : index
    %20 = vector.load %arg6[%c0_22, %c2] : memref<16x128xf32, #tpu.memory_space<vmem>>, vector<8x15xf32>
    %21 = tpu.concatenate %19, %20 in 0 : vector<8x15xf32>, vector<8x15xf32> -> vector<16x15xf32>
    %c1_23 = arith.constant 1 : index
    %c0_24 = arith.constant 0 : index
    %c0_25 = arith.constant 0 : index
    %22 = vector.load %arg2[%c1_23, %c0_24, %c0_25] : memref<2x16x128xf32, #tpu.memory_space<vmem>>, vector<1x16x16xf32>
    %23 = vector.shape_cast %22 : vector<1x16x16xf32> to vector<16x16xf32>
    %cst_26 = arith.constant dense<0.000000e+00> : vector<16x15xf32>
    %24 = tpu.matmul %23, %21, %cst_26 {dimension_numbers = #tpu.dot_dimension_numbers<[1], [0], [0], [1], [0, 0, 1, 1], [], []>} : vector<16x16xf32>, vector<16x15xf32>, vector<16x15xf32> -> vector<16x15xf32>
    %c1_27 = arith.constant 1 : index
    %c0_28 = arith.constant 0 : index
    %c0_29 = arith.constant 0 : index
    %25 = vector.load %arg3[%c1_27, %c0_28, %c0_29] : memref<2x16x1xf32, #tpu.memory_space<vmem>>, vector<1x16x1xf32>
    %26 = vector.shape_cast %25 : vector<1x16x1xf32> to vector<16x1xf32>
    %27 = vector.broadcast %26 : vector<16x1xf32> to vector<16x15xf32>
    %28 = arith.addf %24, %27 : vector<16x15xf32>
    %cst_30 = arith.constant 0.000000e+00 : f32
    %29 = vector.broadcast %cst_30 : f32 to vector<16x15xf32>
    %30 = arith.maximumf %28, %29 : vector<16x15xf32>
    %c0_31 = arith.constant 0 : index
    %c0_32 = arith.constant 0 : index
    %c0_33 = arith.constant 0 : index
    %31 = vector.load %arg4[%c0_31, %c0_32, %c0_33] : memref<1x16x15xf32, #tpu.memory_space<vmem>>, vector<1x16x15xf32>
    %32 = vector.shape_cast %31 : vector<1x16x15xf32> to vector<16x15xf32>
    %33 = vector.shape_cast %30 : vector<16x15xf32> to vector<1x16x15xf32>
    tpu.vector_store %arg4[%c0_31, %c0_32, %c0_33], %33 {strides = array<i32>} : memref<1x16x15xf32, #tpu.memory_space<vmem>>, vector<1x16x15xf32>,
    return
  }
  func.func @transform_0(%arg0: i32) -> (i32, i32, i32) {
    %c0_i32 = arith.constant 0 : i32
    %c0_i32_0 = arith.constant 0 : i32
    %c0_i32_1 = arith.constant 0 : i32
    return %arg0, %c0_i32, %c0_i32_0 : i32, i32, i32
  }
  func.func @transform_1(%arg0: i32) -> (i32, i32, i32) {
    %c0_i32 = arith.constant 0 : i32
    %c0_i32_0 = arith.constant 0 : i32
    %c0_i32_1 = arith.constant 0 : i32
    %c0_i32_2 = arith.constant 0 : i32
    return %c0_i32, %c0_i32_0, %c0_i32_1 : i32, i32, i32
  }
  func.func @transform_2(%arg0: i32) -> (i32, i32, i32) {
    %c0_i32 = arith.constant 0 : i32
    %c0_i32_0 = arith.constant 0 : i32
    %c0_i32_1 = arith.constant 0 : i32
    %c0_i32_2 = arith.constant 0 : i32
    return %c0_i32, %c0_i32_0, %c0_i32_1 : i32, i32, i32
  }
  func.func @transform_3(%arg0: i32) -> (i32, i32, i32) {
    %c0_i32 = arith.constant 0 : i32
    %c0_i32_0 = arith.constant 0 : i32
    %c0_i32_1 = arith.constant 0 : i32
    return %arg0, %c0_i32, %c0_i32_0 : i32, i32, i32
  }
}

</mosaic_0001>

<bundles_post_ra>
// kernel: tpu_custom_call.1
= control target key start
LH: loop header
LB: loop body
LE: loop exit
PB: predicated region body
PF: predicated region fallthrough
CT: control target
= control target key end

     0   :  { %8 = vsyncpa [#allocation5], 0  ;;  %s636_s0 = inlined_call_operand.hbm [shape: f32[2,4,16], index: 0, kind: input, shape index: {}]   ;;  %s637_s1 = inlined_call_operand.vmem [shape: f32[2,16,128], index: 1, kind: input, shape index: {}]   ;;  %s638_s2 = inlined_call_operand.vmem [shape: f32[2,16,1], index: 2, kind: input, shape index: {}]   ;;  %s639_s3 = inlined_call_operand.vmem [shape: f32[2,16,15], index: 3, kind: output, shape index: {}]  }
   0x1   :  { %10 = vsyncpa [#allocation5 + $0x1], 0  ;;  %s524_s12 = smov 0   ;;  %s526_s13 = smov 0  }
   0x2   :  { %s528_s14 = smov 0   ;;  %s530_s15 = smov 0  }
   0x3 LB: > { %s543_s16 = sadd.s32 4294967295, %s497_s15   ;;  %s546_s17 = sadd.s32 1, %s497_s15   ;;  %s497_s15 = sphi %s530_s15, %s646_s15   ;;  %s493_s14 = sphi %s528_s14, %s645_s14   ;;  %s489_s13 = sphi %s526_s13, %s644_s13   ;;  %s485_s12 = sphi %s524_s12, %s643_s12  }
   0x4   : > { %s20_s18 = ssub.s32 %s497_s15, %s546_s17  ;;  %s23_s19 = sadd.s32 1, %s493_s14 }
   0x5   : > { %p21_p0 = scmp.eq.s32.totalorder %s20_s18, 0  ;;  %p30_p1 = scmp.ne.s32.totalorder %s493_s14, %s489_s13 }
   0x6   : > { %p31_p2 = scmp.eq.s32.totalorder %s497_s15, 0  ;;  %p36_p3 = scmp.ne.s32.totalorder %s489_s13, %s485_s12 }
   0x7   : > { %s556_s20 = scalar_select %p21_p0, %s493_s14, %s23_s19  }
   0x8   : > { %p558_p4 = por %p31_p2, %p30_p1  ;;  %p37_p5 = scmp.eq.s32.totalorder %s543_s16, 0 }
   0x9   : > { %p393_p6 = scmp.lt.s32.totalorder %s497_s15, 2  ;;  %s134_s23 = sand.u32 1, %s493_s14  }
   0xa   : > { %p564_p7 = por %p37_p5, %p36_p3  ;;  %s369_s24 = sshll.u32 %s134_s23, 2 }
   0xb   : > { %s370_s25 = sshll.u32 %s497_s15, 2  ;;  %s138_s29 = scalar_lea.vmem [#allocation4], %s369_s24 }
   0xc   : > { %s142_s28 = scalar_lea.hbm %s636_s0, %s370_s25  ;;  %s146_s30 = sshll.u32 %s138_s29, 4  ;;  %s147_s30 = int_to_ptr.vmem [resolvable:$true] %s146_s30 }
   0xd   : > { %s144_s4 = sshll.u32 %s142_s28, 4  ;;  %p575_p8 = pnand %p393_p6, %p558_p4  ;;  %s145_s4 = int_to_ptr.hbm [resolvable:$true] %s144_s4 }
   0xe   : > { %p371_p9 = scmp.ge.s32.totalorder %s497_s15, 1  ;;  %p151_p10 = scmp.lt.s32.totalorder %s497_s15, 3 }
   0xf   : > { %s135_s6 = scalar_lea.sflag [#allocation5], %s134_s23  ;;  %s433_s7 = sshra.s32 %s145_s4, 4  ;;  %s434_s7 = int_to_ptr.hbm [resolvable:$true] %s433_s7 }
  0x10   : > { %s435_s8 = scalar_lea.hbm %s434_s7, 4  ;;  %p437_p12 = pneg %p575_p8 }
  0x11   : > { %p436_p11 = scmp.ne.s32.totalorder %s434_s7, %s435_s8  ;;  %s440_s11 = scalar_lea.hbm %s636_s0, 8 }
  0x12   : > { %p441_p1 = scmp.lt.s32.totalorder %s434_s7, %s636_s0  ;;  %p442_p2 = scmp.lt.s32.totalorder %s440_s11, %s435_s8 }
  0x13   : > { %p438_p13 = pnand %p437_p12, %p436_p11 }
  0x14   : > { %p443_p3 = por %p442_p2, %p441_p1 }
  0x15   : > { %p439_p0 = pneg %p438_p13 }
  0x17   : > { %p444_p4 = pnand %p443_p3, %p439_p0 }
  0x19   : > { %447 = shalt.err (!%p444_p4)
}
  0x1a   : > { %392 = dma.hbm_to_vmem [thread:$0]  (!%p575_p8), %s145_s4, 64, %s147_s30, %s135_s6  }
  0x1b   : > { %p152_p5 = pnand %p371_p9, %p151_p10 }
  0x1c   : > { %s157_s19 = sand.u32 (!%p152_p5), 1, %s489_s13  }
  0x1d   : > { %155 = sbr.rel (%p152_p5) target bundleno = 671 (0x29f), region = 32  ;;  %s372_s21 = sshll.u32 (!%p152_p5), %s157_s19, 2 }
  0x1e   : > { %s158_s23 = scalar_lea.sflag (!%p152_p5), [#allocation5], %s157_s19  ;;  %s161_s24 = scalar_lea.vmem (!%p152_p5), [#allocation4], %s372_s21 }
  0x22   : > { %480 = dma.done.wait (%p564_p7), %s158_s23, 64  }
  0x23   : > { %482 = vsyncadd (%p564_p7), %s158_s23, 4294967232  ;;  %vm191_vm0 = vcmask 125952   ;;  %v190_v0 = vld [vmem:[%s161_s24] sm:$0xf]  ;;  %s499_s25 = smov 127   ;;  %v500_v4 = vmov 0  }
  0x24   : > { %192 = vst.msk [vmem:[#allocation2] sm:$0xf] %vm191_vm0, %v190_v0  ;;  %v202_v3 = vld [vmem:[%s638_s2] sm:$0xff]  ;;  %431 = vset.pattern.permute.xlu0 %v500_v4  ;;  %432 = vset.pattern.permute.xlu2 %v500_v4  ;;  %vm199_vm1 = vcmask 1043456   ;;  %vm208_vm2 = vcmask 64512   ;;  %vm233_vm3 = vcmask 7168  }
  0x25   : > { %v201_v6 = vld [vmem:[%s637_s1] sm:$0xff]  ;;  %vm235_vm4 = vcmask 138368   ;;  %v501_v8 = vmov 0.0   ;;  %s502_s28 = smov 1   ;;  %vm241_vm5 = vcmask 130056   ;;  %s503_s29 = smov 126  }
  0x26   : > { %234 = vst.msk [vmem:[#allocation3] sm:$0xff] %vm233_vm3, %v501_v8  ;;  %v378_v15 = vld [vmem:[%s638_s2 + $0x10] sm:$0xff]  ;;  %v379_v16 = vld [vmem:[%s638_s2 + $0x18] sm:$0xff]  ;;  %vm264_vm6 = vcmask 130048   ;;  %p185_p6 = scmp.lt.s32.totalorder %s543_s16, 1  ;;  %vm296_vm7 = vcmask 121856  }
  0x27   : > { %236 = vst.msk [vmem:[#allocation3] sm:$0xff] %vm235_vm4, %v501_v8  ;;  %256 = vperm.xlu2 %432, %v378_v15   ;;  %v376_v18 = vld [vmem:[%s637_s1 + $0x10] sm:$0xff]  ;;  %v377_v19 = vld [vmem:[%s637_s1 + $0x18] sm:$0xff] }
  0x28   : > { %s648_s16 = smov (!%p185_p6, %s543_s16), 1 }
  0x29   : > { %s384_s11 = sshll.u32 %s648_s16, 4 }
  0x2a   : > { %s189_s19 = scalar_lea.vmem %s639_s3, %s384_s11 }
  0x2b   : > { %v193_v1 = vld [vmem:[#allocation2] sm:$0xf] }
  0x2c   : > { %v195_v2 = vrot.slane %v193_v1, 4 }
  0x2e   : > { %196 = vrot.lane.b32.xlu0 %v195_v2, %s499_s25 }
  0x2f   : > { %261 = vperm.xlu2 %432, %v379_v16  }
  0x36   : > { %205 = vperm.xlu0 %431, %v202_v3  }
  0x81   : > { %v257_v20 = vpop.permute.xlu2 %256 }
  0x89   : > { %v262_v24 = vpop.permute.xlu2 %261 }
  0xa0   : > { %v197_v5 = vpop.permute.xlu0 %196 }
  0xa1   : > { %v200_v7 = vsel %vm199_vm1, %v193_v1, %v197_v5 }
  0xa2   : > { %227 = vmatpush.msra.mxu0 %v200_v7 }
  0xa3   : > { %375 = vmatmul.msk.f32.vlgmr.msra.gmra.mxu0 %vm208_vm2, %v201_v6 }
  0xa8   : > { %v206_v9 = vpop.permute.xlu0 %205 }
 0x120   : > { %v229_v10 = vpop.f32.mrf.mxu0 }
 0x121   : > { %v230_v11 = vadd.f32 %v229_v10, %v206_v9 }
 0x123   : > { %v232_v12 = vmax.f32 %v230_v11, 0.0 }
 0x125   : > { %238 = vrot.lane.b32.xlu1 %v232_v12, %s502_s28 }
 0x197   : > { %v239_v13 = vpop.permute.xlu1 %238 }
 0x198   : > { %242 = vst.msk [vmem:[#allocation3] sm:$0xff] %vm241_vm5, %v239_v13 }
 0x19f   : > { %v243_v14 = vld [vmem:[#allocation3] sm:$0xff] }
 0x1a0   : > { %245 = vrot.lane.b32.xlu1 %v243_v14, %s503_s29 }
 0x212   : > { %v246_v17 = vpop.permute.xlu1 %245 }
 0x213   : > { %285 = vmatpush.msra.mxu1 %v246_v17  ;;  %385 = vmatpush.msra.mxu2 %v246_v17 }
 0x215   : > { %286 = vmatpush.msra.mxu1 %v243_v14  ;;  %386 = vmatpush.msra.mxu2 %v243_v14 }
 0x216   : > { %380 = vmatmul.msk.f32.vlgmr.msra.gmra.mxu1 %vm264_vm6, %v376_v18  ;;  %381 = vmatmul.msk.f32.vlgmr.msra.gmra.mxu2 %vm264_vm6, %v377_v19 }
 0x293   : > { %v288_v21 = vpop.f32.mrf.mxu1 }
 0x294   : > { %v289_v22 = vadd.f32 %v288_v21, %v257_v20 }
 0x296   : > { %v294_v23 = vmax.f32 %v289_v22, 0.0 }
 0x298   : > { %297 = vst.msk [vmem:[%s189_s19] sm:$0xff] %vm296_vm7, %v294_v23 }
 0x299   : > { %v291_v25 = vpop.f32.mrf.mxu2 }
 0x29a   : > { %v292_v26 = vadd.f32 %v291_v25, %v262_v24 }
 0x29c   : > { %v295_v27 = vmax.f32 %v292_v26, 0.0 }
 0x29e   : > { %298 = vst.msk [vmem:[%s189_s19 + $0x8] sm:$0xff] %vm296_vm7, %v295_v27 }
 0x29f PF: > { %p13_p7 = scmp.ge.s32.totalorder %s546_s17, 4   ;;  %s643_s12 = smov %s489_s13 }
 0x2a0   : > { %s644_s13 = smov %s493_s14  ;;  %s645_s14 = smov %s556_s20 }
 0x2a1   : > { %s646_s15 = smov %s546_s17  ;;  %15 = sbr.rel (!%p13_p7) target bundleno = 3 (0x3), region = 74 }
 0x2a6   :  { %320 = vsyncpa [#allocation5], 1 }
 0x2a7   :  { %322 = vsyncpa [#allocation5 + $0x1], 1 }

</bundles_post_ra>
